<compile_context>
chip_gen: v6e
topology: v6e:2x2x1
jax: 0.10.0
libtpu: 0.0.40
codegen_flags: <defaults>
</compile_context>

<pallas_src>
import math

import jax
import jax.numpy as jnp
from jax.experimental import pallas as pl
from jax.experimental.pallas import tpu as pltpu


def _noisy_linear_kernel_single(decay_ref, x_mm_ref, x_res_ref, a_ref, b_ref,
                                o_ref):
    """Single K block: y = (x @ A + b) * d + x * (1 - d)."""
    acc = jnp.dot(x_mm_ref[...], a_ref[...], preferred_element_type=jnp.float32)
    y = acc + b_ref[...]
    d = decay_ref[0]
    one_minus_d = decay_ref[1]
    o_ref[...] = (y * d
                  + x_res_ref[...].astype(jnp.float32) * one_minus_d
                  ).astype(o_ref.dtype)


def _noisy_linear_kernel_multi(decay_ref, x_mm_ref, x_res_ref, a_ref, b_ref,
                               o_ref, acc_ref):
    """K-tiled fallback with f32 VMEM accumulator (large feature counts)."""
    k = pl.program_id(2)

    @pl.when(k == 0)
    def _():
        acc_ref[...] = jnp.zeros_like(acc_ref)

    acc_ref[...] += jnp.dot(x_mm_ref[...], a_ref[...],
                            preferred_element_type=jnp.float32)

    @pl.when(k == pl.num_programs(2) - 1)
    def _():
        d = decay_ref[0]
        one_minus_d = decay_ref[1]
        y = acc_ref[...] + b_ref[...]
        o_ref[...] = (y * d
                      + x_res_ref[...].astype(jnp.float32) * one_minus_d
                      ).astype(o_ref.dtype)


def _round_up(v, m):
    return (v + m - 1) // m * m


def noisy_linear(x, weight_mu, weight_sigma, eps_in, eps_out,
                 bias_mu, bias_sigma, bias_eps, decay,
                 *, tm=512, tn=512, tk_max=2048, matmul_dtype=jnp.bfloat16):
    """y = (x @ (wmu + wsig*(eps_out⊗eps_in)).T + bmu + bsig*beps)*d + x*(1-d)."""
    n, in_f = x.shape
    out_f = weight_mu.shape[0]
    assert in_f == out_f, "residual blend requires in_features == out_features"
    f32 = jnp.float32
    mm_dtype = jnp.dtype(matmul_dtype)

    # --- Fold noise + transpose ONCE in the wrapper (free: pad materialises
    # the full tensor anyway).  A_t is (K, N); bias is a single vector.
    a_full = (weight_mu.astype(f32)
              + weight_sigma.astype(f32)
              * jnp.outer(eps_out.astype(f32), eps_in.astype(f32))).T  # (in, out)
    b_full = bias_mu.astype(f32) + bias_sigma.astype(f32) * bias_eps.astype(f32)

    # --- Tile selection.
    row_align = 16 if mm_dtype == jnp.bfloat16 else 8   # bf16 sublane packing
    mp0 = _round_up(n, row_align)
    tm_eff = min(tm, mp0)
    mp = _round_up(mp0, tm_eff)
    grid_m = mp // tm_eff

    np128 = _round_up(out_f, 128)
    tn_eff = min(tn, np128)
    # v7x has 2 TensorCores sharded over "parallel" axes: keep >= 2 parallel
    # blocks when the batch fits a single row block.
    if grid_m == 1 and np128 // tn_eff <= 1 and np128 >= 256:
        tn_eff = _round_up(np128 // 2, 128)
    np_ = _round_up(np128, tn_eff)
    grid_n = np_ // tn_eff

    kp128 = _round_up(in_f, 128)
    if kp128 <= tk_max:
        tk_eff = kp128                       # collapse K: no accumulator needed
    else:
        tk_eff = max(128, min(512, tk_max))
    kp = _round_up(kp128, tk_eff)
    grid_k = kp // tk_eff

    # --- Pad + cast to the streaming dtype (bf16 by default: half DMA bytes,
    # half VMEM per block, no in-kernel casts).
    fp = max(kp, np_)    # single padded x serves both matmul and residual reads
    xp = jnp.zeros((mp, fp), mm_dtype).at[:n, :in_f].set(x.astype(mm_dtype))
    a_t = jnp.zeros((kp, np_), mm_dtype).at[:in_f, :out_f].set(
        a_full.astype(mm_dtype))
    b_p = jnp.zeros((1, np_), f32).at[0, :out_f].set(b_full)
    decay_arr = jnp.asarray([decay, 1.0 - decay], dtype=f32)   # [d, 1-d] in SMEM

    # --- VMEM budget: double-buffered inputs/outputs (+ acc if K is tiled),
    # capped at 48 MiB to stay inside v7x's 64 MiB physical VMEM.
    itemsize = mm_dtype.itemsize
    out_itemsize = jnp.dtype(x.dtype).itemsize
    per_step = (2 * (tm_eff * tk_eff + tm_eff * tn_eff + tk_eff * tn_eff) * itemsize
                + 2 * tn_eff * 4
                + 2 * tm_eff * tn_eff * out_itemsize
                + (tm_eff * tn_eff * 4 if grid_k > 1 else 0))
    vmem_limit = int(min(48 << 20, max(2 * per_step + (4 << 20), 32 << 20)))

    if grid_k == 1:
        kernel = _noisy_linear_kernel_single
        grid = (grid_m, grid_n)
        in_specs = [
            pl.BlockSpec(memory_space=pltpu.MemorySpace.SMEM),     # [d, 1-d]
            pl.BlockSpec((tm_eff, tk_eff), lambda i, j: (i, 0)),   # x (matmul)
            pl.BlockSpec((tm_eff, tn_eff), lambda i, j: (i, j)),   # x (residual)
            pl.BlockSpec((tk_eff, tn_eff), lambda i, j: (0, j)),   # folded A^T
            pl.BlockSpec((1, tn_eff), lambda i, j: (0, j)),        # folded bias
        ]
        out_specs = pl.BlockSpec((tm_eff, tn_eff), lambda i, j: (i, j))
        scratch_shapes = []
        dim_sem = ("parallel", "parallel")
    else:
        kernel = _noisy_linear_kernel_multi
        grid = (grid_m, grid_n, grid_k)
        in_specs = [
            pl.BlockSpec(memory_space=pltpu.MemorySpace.SMEM),          # [d, 1-d]
            pl.BlockSpec((tm_eff, tk_eff), lambda i, j, k: (i, k)),     # x (matmul)
            pl.BlockSpec((tm_eff, tn_eff), lambda i, j, k: (i, j)),     # x (residual)
            pl.BlockSpec((tk_eff, tn_eff), lambda i, j, k: (k, j)),     # folded A^T
            pl.BlockSpec((1, tn_eff), lambda i, j, k: (0, j)),          # folded bias
        ]
        out_specs = pl.BlockSpec((tm_eff, tn_eff), lambda i, j, k: (i, j))
        scratch_shapes = [pltpu.VMEM((tm_eff, tn_eff), jnp.float32)]
        dim_sem = ("parallel", "parallel", "arbitrary")

    out = pl.pallas_call(
        kernel,
        out_shape=jax.ShapeDtypeStruct((mp, np_), x.dtype),
        grid_spec=pltpu.PrefetchScalarGridSpec(
            num_scalar_prefetch=0,
            grid=grid,
            in_specs=in_specs,
            out_specs=out_specs,
            scratch_shapes=scratch_shapes,
        ),
        compiler_params=pltpu.CompilerParams(
            dimension_semantics=dim_sem,
            vmem_limit_bytes=vmem_limit),
    )(decay_arr, xp, xp, a_t, b_p)
    return out[:n, :out_f]


def scale_noise(key, shape):
    # sign(z) * sqrt(|z|) over standard normal samples, as in NoisyLinear.scale_noise
    z = jax.random.normal(key, shape, dtype=jnp.float32)
    return jnp.sign(z) * jnp.sqrt(jnp.abs(z))


def _reference(x, wmu, wsig, eps_in, eps_out, bmu, bsig, beps, decay):
    a = wmu + wsig * jnp.outer(eps_out, eps_in)
    b = bmu + bsig * beps
    y = jnp.dot(x, a.T, precision=jax.lax.Precision.HIGHEST) + b
    return y * decay + x * (1.0 - decay)


if __name__ == "__main__":
    def run_case(n, feat, matmul_dtype, tol, **kw):
        std_init = 0.2 / 260 / 2                     # factorised default
        mu_range = 1.0 / math.sqrt(feat)
        root = jax.random.PRNGKey(0)
        k_x, k_wmu, k_bmu, k_ein, k_eout, k_eb = jax.random.split(root, 6)

        # Deterministic params mirroring reset_parameters(factorised=True, bias=True)
        wmu = jax.random.uniform(k_wmu, (feat, feat), jnp.float32, -mu_range, mu_range)
        wsig = jnp.full((feat, feat), std_init / math.sqrt(feat), jnp.float32)
        bmu = jax.random.uniform(k_bmu, (feat,), jnp.float32, -mu_range, mu_range)
        bsig = jnp.full((feat,), std_init / math.sqrt(feat), jnp.float32)

        # Factorised noise vectors (folded into the weight in the wrapper)
        eps_in = scale_noise(k_ein, (feat,))
        eps_out = scale_noise(k_eout, (feat,))
        beps = scale_noise(k_eb, (feat,))

        # decay = max(decay_factor ** n_decay_factor, cutoff) = max(5e-4, 0.2)
        decay = max(0.0005 ** 1, 0.2)

        x = jax.random.normal(k_x, (n, feat), dtype=jnp.float32)

        out = noisy_linear(x, wmu, wsig, eps_in, eps_out, bmu, bsig, beps, decay,
                           matmul_dtype=matmul_dtype, **kw)
        out = jax.block_until_ready(out)

        ref = _reference(x, wmu, wsig, eps_in, eps_out, bmu, bsig, beps, decay)
        assert out.shape == (n, feat)
        err = float(jnp.max(jnp.abs(out - ref)))
        assert jnp.allclose(out, ref, atol=tol, rtol=tol), f"max abs err {err}"

    # Small aligned case, bf16 MXU operands (new default), collapsed-K grid.
    run_case(64, 128, jnp.bfloat16, 5e-2)
    # Small unaligned case exercising the zero-padding / slicing path (f32 MXU).
    run_case(40, 96, jnp.float32, 5e-3)
    # Single row block -> N split into 2 parallel blocks (v7x 2-TC rule), bf16.
    run_case(256, 256, jnp.bfloat16, 5e-2)
    # Same shape with f32 MXU operands for a tighter tolerance check.
    run_case(256, 256, jnp.float32, 5e-3)
    # Force the multi-K (3-D grid + f32 accumulator) fallback path at small shape.
    run_case(256, 256, jnp.bfloat16, 5e-2, tk_max=128)

    print("KERNEL_OK")
</pallas_src>

<mosaic_0001>
module attributes {stable_mosaic.version = 11 : i64} {
  func.func @_noisy_linear_kernel_single(%arg0: i32, %arg1: i32, %arg2: memref<2xf32, #tpu.memory_space<smem>>, %arg3: memref<64x128xbf16, #tpu.memory_space<vmem>>, %arg4: memref<64x128xbf16, #tpu.memory_space<vmem>>, %arg5: memref<128x128xbf16, #tpu.memory_space<vmem>>, %arg6: memref<1x128xf32, #tpu.memory_space<vmem>>, %arg7: memref<64x128xf32, #tpu.memory_space<vmem>>) attributes {dimension_semantics = [#tpu.dimension_semantics<parallel>, #tpu.dimension_semantics<parallel>], iteration_bounds = array<i64: 1, 1>, scalar_prefetch = 0 : i64, scratch_operands = 0 : i64, tpu.core_type = #tpu.core_type<tc>, window_params = [{transform_indices = @transform_0, window_bounds = array<i64: 2>}, {transform_indices = @transform_1, window_bounds = array<i64: 64, 128>}, {transform_indices = @transform_2, window_bounds = array<i64: 64, 128>}, {transform_indices = @transform_3, window_bounds = array<i64: 128, 128>}, {transform_indices = @transform_4, window_bounds = array<i64: 1, 128>}, {transform_indices = @transform_5, window_bounds = array<i64: 64, 128>}]} {
    %c0 = arith.constant 0 : index
    %c0_0 = arith.constant 0 : index
    %0 = vector.load %arg3[%c0, %c0_0] : memref<64x128xbf16, #tpu.memory_space<vmem>>, vector<64x128xbf16>
    %c0_1 = arith.constant 0 : index
    %c0_2 = arith.constant 0 : index
    %1 = vector.load %arg5[%c0_1, %c0_2] : memref<128x128xbf16, #tpu.memory_space<vmem>>, vector<128x128xbf16>
    %cst = arith.constant dense<0.000000e+00> : vector<64x128xf32>
    %2 = tpu.matmul %0, %1, %cst {dimension_numbers = #tpu.dot_dimension_numbers<[1], [0], [0], [1], [0, 0, 1, 1], [], []>} : vector<64x128xbf16>, vector<128x128xbf16>, vector<64x128xf32> -> vector<64x128xf32>
    %c0_3 = arith.constant 0 : index
    %c0_4 = arith.constant 0 : index
    %3 = vector.load %arg6[%c0_3, %c0_4] : memref<1x128xf32, #tpu.memory_space<vmem>>, vector<1x128xf32>
    %4 = vector.broadcast %3 : vector<1x128xf32> to vector<64x128xf32>
    %5 = arith.addf %2, %4 : vector<64x128xf32>
    %c0_5 = arith.constant 0 : index
    %6 = memref.load %arg2[%c0_5] : memref<2xf32, #tpu.memory_space<smem>>
    %c1 = arith.constant 1 : index
    %7 = memref.load %arg2[%c1] : memref<2xf32, #tpu.memory_space<smem>>
    %8 = vector.broadcast %6 : f32 to vector<64x128xf32>
    %9 = arith.mulf %5, %8 : vector<64x128xf32>
    %c0_6 = arith.constant 0 : index
    %c0_7 = arith.constant 0 : index
    %10 = vector.load %arg4[%c0_6, %c0_7] : memref<64x128xbf16, #tpu.memory_space<vmem>>, vector<64x128xbf16>
    %11 = arith.extf %10 : vector<64x128xbf16> to vector<64x128xf32>
    %12 = vector.broadcast %7 : f32 to vector<64x128xf32>
    %13 = arith.mulf %11, %12 : vector<64x128xf32>
    %14 = arith.addf %9, %13 : vector<64x128xf32>
    %c0_8 = arith.constant 0 : index
    %c0_9 = arith.constant 0 : index
    %15 = vector.load %arg7[%c0_8, %c0_9] : memref<64x128xf32, #tpu.memory_space<vmem>>, vector<64x128xf32>
    tpu.vector_store %arg7[%c0_8, %c0_9], %14 {strides = array<i32>} : memref<64x128xf32, #tpu.memory_space<vmem>>, vector<64x128xf32>,
    return
  }
  func.func @transform_0(%arg0: i32, %arg1: i32) -> i32 {
    %c0_i32 = arith.constant 0 : i32
    %c0_i32_0 = arith.constant 0 : i32
    return %c0_i32 : i32
  }
  func.func @transform_1(%arg0: i32, %arg1: i32) -> (i32, i32) {
    %c0_i32 = arith.constant 0 : i32
    %c0_i32_0 = arith.constant 0 : i32
    return %arg0, %c0_i32 : i32, i32
  }
  func.func @transform_2(%arg0: i32, %arg1: i32) -> (i32, i32) {
    %c0_i32 = arith.constant 0 : i32
    return %arg0, %arg1 : i32, i32
  }
  func.func @transform_3(%arg0: i32, %arg1: i32) -> (i32, i32) {
    %c0_i32 = arith.constant 0 : i32
    %c0_i32_0 = arith.constant 0 : i32
    return %c0_i32, %arg1 : i32, i32
  }
  func.func @transform_4(%arg0: i32, %arg1: i32) -> (i32, i32) {
    %c0_i32 = arith.constant 0 : i32
    %c0_i32_0 = arith.constant 0 : i32
    return %c0_i32, %arg1 : i32, i32
  }
  func.func @transform_5(%arg0: i32, %arg1: i32) -> (i32, i32) {
    %c0_i32 = arith.constant 0 : i32
    return %arg0, %arg1 : i32, i32
  }
}

</mosaic_0001>

<bundles_post_ra>
// kernel: tpu_custom_call.1
= control target key start
LH: loop header
LB: loop body
LE: loop exit
PB: predicated region body
PF: predicated region fallthrough
CT: control target
= control target key end

     0   :  { %10 = vsyncpa [#allocation5], 0  ;;  %s572_s0 = inlined_call_operand.hbm [shape: f32[2], index: 0, kind: input, shape index: {}]   ;;  %s573_s1 = inlined_call_operand.hbm [shape: bf16[64,128], index: 1, kind: input, shape index: {}]   ;;  %s574_s2 = inlined_call_operand.hbm [shape: bf16[64,128], index: 2, kind: input, shape index: {}]   ;;  %s575_s3 = inlined_call_operand.hbm [shape: bf16[128,128], index: 3, kind: input, shape index: {}]   ;;  %s576_s4 = inlined_call_operand.vmem [shape: f32[1,128], index: 4, kind: input, shape index: {}]   ;;  %s577_s5 = inlined_call_operand.hbm [shape: f32[64,128], index: 5, kind: output, shape index: {}]  }
   0x1   :  { %11 = vsyncpa [#allocation3], 0 }
   0x2   :  { %12 = vsyncpa [#allocation8], 0 }
   0x3   :  { %13 = vsyncpa [#allocation4], 0  ;;  %s515_s18 = smov [#allocation7]   ;;  %s516_s20 = smov [#allocation6]  }
   0x4   :  { %s39_s19 = sshll.u32 %s515_s18, 4  ;;  %s27_s21 = sshll.u32 %s516_s20, 4  ;;  %s40_s19 = int_to_ptr.vmem [resolvable:$true] %s39_s19  ;;  %s28_s21 = int_to_ptr.vmem [resolvable:$true] %s27_s21 }
   0x5   :  { %s427_s22 = scalar_lea.vmem %s40_s19, 512  ;;  %p432_p1 = scmp.lt.s32.totalorder %s40_s19, %s40_s19 }
   0x6   :  { %p428_p0 = scmp.ne.s32.totalorder %s40_s19, %s427_s22  ;;  %p433_p2 = scmp.lt.s32.totalorder %s427_s22, %s427_s22 }
   0x8   :  { %p434_p3 = por %p433_p2, %p432_p1 }
   0xa   :  { %p435_p4 = pnand %p434_p3, %p428_p0 }
   0xc   :  { %438 = shalt.err (!%p435_p4)
}
   0xd   :  { %s517_s23 = smov 64   ;;  %s518_s24 = smov 4  }
   0xe   :  { %45 = dma.hbm_to_vmem [thread:$0]  %s574_s2, 512, %s40_s19, [#allocation8], %s517_s23, %s517_s23, %s518_s24  }
   0xf   :  { %s519_s27 = smov [#allocation2]   ;;  %s455_s30 = scalar_lea.vmem %s28_s21, 512 }
  0x10   :  { %21 = dma.hbm_to_smem %s572_s0, 16, %s519_s27, [#allocation5]  }
  0x11   :  { %p456_p5 = scmp.ne.s32.totalorder %s28_s21, %s455_s30  ;;  %p460_p6 = scmp.lt.s32.totalorder %s28_s21, %s28_s21 }
  0x12   :  { %p461_p7 = scmp.lt.s32.totalorder %s455_s30, %s455_s30 }
  0x14   :  { %p462_p8 = por %p461_p7, %p460_p6 }
  0x16   :  { %p463_p9 = pnand %p462_p8, %p456_p5 }
  0x18   :  { %466 = shalt.err (!%p463_p9)
}
  0x19   :  { %33 = dma.hbm_to_vmem [thread:$0]  %s573_s1, 512, %s28_s21, [#allocation3], %s517_s23, %s517_s23, %s518_s24  }
  0x1a   :  { %s520_s8 = smov [#allocation9]  }
  0x1b   :  { %s51_s9 = sshll.u32 %s520_s8, 4  ;;  %s52_s9 = int_to_ptr.vmem [resolvable:$true] %s51_s9 }
  0x1c   :  { %s475_s2 = scalar_lea.vmem %s52_s9, 1024  ;;  %p480_p11 = scmp.lt.s32.totalorder %s52_s9, %s52_s9 }
  0x1d   :  { %p476_p10 = scmp.ne.s32.totalorder %s52_s9, %s475_s2  ;;  %p481_p12 = scmp.lt.s32.totalorder %s475_s2, %s475_s2 }
  0x1f   :  { %p482_p13 = por %p481_p12, %p480_p11 }
  0x21   :  { %p483_p0 = pnand %p482_p13, %p476_p10 }
  0x23   :  { %486 = shalt.err (!%p483_p0)
}
  0x24   :  { %57 = dma.hbm_to_vmem [thread:$0]  %s575_s3, 1024, %s52_s9, [#allocation8], %s517_s23, %s517_s23, %s518_s24  }
  0x25   :  { %507 = dma.done.wait [#allocation5], 16  }
  0x26   :  { %508 = vsyncadd [#allocation5], 4294967280 }
  0x27   :  { %509 = dma.done.wait [#allocation3], 512  }
  0x28   :  { %510 = vsyncadd [#allocation3], 4294966784 }
  0x29   :  { %511 = dma.done.wait [#allocation8], 1536  }
  0x2a   :  { %512 = vsyncadd [#allocation8], 4294965760 }
  0x2b   :  { %72 = sfence }
  0x2c   :  { %v407_v0 = vld [vmem:[#allocation9 + $0x38] sm:$0xff]   ;;  %v408_v1 = vld [vmem:[#allocation9 + $0x30] sm:$0xff]   ;;  %v409_v2 = vld [vmem:[#allocation9 + $0x28] sm:$0xff]   ;;  %s326_s1 = sld [smem:[#allocation2 + $0x1]] }
  0x2d   :  { %358 = vmatprep.subr.bf16.mxu0 %v407_v0  ;;  %382 = vmatprep.subr.bf16.mxu1 %v407_v0  ;;  %v410_v3 = vld [vmem:[#allocation9 + $0x20] sm:$0xff]   ;;  %v416_v5 = vld [vmem:[#allocation6 + $0x10] sm:$0xff]   ;;  %v411_v6 = vld [vmem:[#allocation9 + $0x18] sm:$0xff]   ;;  %s242_s3 = sld [smem:[#allocation2]] }
  0x2e   :  { %359 = vmatpush3.bf16.msra.mxu0 %v407_v0  ;;  %390 = vmatpush3.bf16.msra.mxu1 %v407_v0  ;;  %v415_v4 = vld [vmem:[#allocation6] sm:$0xff]   ;;  %v412_v7 = vld [vmem:[#allocation9 + $0x10] sm:$0xff]   ;;  %v413_v8 = vld [vmem:[#allocation9 + $0x8] sm:$0xff]  }
  0x2f   :  { %360 = vmatprep.subr.bf16.mxu0 %v408_v1  ;;  %383 = vmatprep.subr.bf16.mxu1 %v408_v1  ;;  %v414_v9 = vld [vmem:[#allocation9] sm:$0xff]   ;;  %v417_v10 = vld [vmem:[#allocation6 + $0x8] sm:$0xff]   ;;  %v418_v11 = vld [vmem:[#allocation6 + $0x18] sm:$0xff]  }
  0x30   :  { %374 = vmatprep.mubr.bf16.mxu0 %v415_v4  ;;  %378 = vmatprep.mubr.bf16.mxu1 %v416_v5  ;;  %v343_v12 = vld [vmem:[#allocation7 + $0x8] sm:$0xff]   ;;  %v345_v13 = vld [vmem:[#allocation7 + $0x18] sm:$0xff]   ;;  %v328_v14 = vld [vmem:[#allocation7] sm:$0xff]  }
  0x31   :  { %v344_v15 = vld [vmem:[#allocation7 + $0x10] sm:$0xff]   ;;  %v333_v16 = vunpack.c.l.bf16 %v343_v12  ;;  %v341_v17 = vunpack.c.l.bf16 %v345_v13  ;;  %v313_v18 = vld [vmem:[%s576_s4] ss:$0 sm:$0xff]  ;;  %v329_v20 = vunpack.c.l.bf16 %v328_v14  ;;  %v334_v25 = vunpack.c.h.bf16 %v343_v12  ;;  %s521_s4 = smov [#allocation10]  }
  0x32   :  { %361 = vmatpush3.bf16.msra.mxu0 %v408_v1  ;;  %391 = vmatpush3.bf16.msra.mxu1 %v408_v1  ;;  %v269_v19 = vstv %s326_s1  ;;  %v337_v21 = vunpack.c.l.bf16 %v344_v15  ;;  %v342_v26 = vunpack.c.h.bf16 %v345_v13  ;;  %v330_v35 = vunpack.c.h.bf16 %v328_v14  ;;  %s299_s13 = sshll.u32 %s521_s4, 4  ;;  %s300_s13 = int_to_ptr.vmem [resolvable:$true] %s299_s13 }
  0x33   :  { %362 = vmatprep.subr.bf16.mxu0 %v409_v2  ;;  %384 = vmatprep.subr.bf16.mxu1 %v409_v2  ;;  %v244_v23 = vstv %s242_s3  ;;  %v272_v28 = vmul.f32 %v333_v16, %v269_v19  ;;  %v276_v30 = vmul.f32 %v341_v17, %v269_v19  ;;  %v270_v32 = vmul.f32 %v329_v20, %v269_v19  ;;  %s487_s14 = scalar_lea.vmem %s300_s13, 1024  ;;  %p492_p2 = scmp.lt.s32.totalorder %s300_s13, %s300_s13 }
  0x34   :  { %v274_v34 = vmul.f32 %v337_v21, %v269_v19  ;;  %v338_v36 = vunpack.c.h.bf16 %v344_v15  ;;  %v273_v42 = vmul.f32 %v334_v25, %v269_v19  ;;  %v277_v44 = vmul.f32 %v342_v26, %v269_v19  ;;  %p488_p1 = scmp.ne.s32.totalorder %s300_s13, %s487_s14  ;;  %p493_p3 = scmp.lt.s32.totalorder %s487_s14, %s487_s14 }
  0x35   :  { %v271_v52 = vmul.f32 %v330_v35, %v269_v19 }
  0x36   :  { %363 = vmatpush3.bf16.msra.mxu0 %v409_v2  ;;  %392 = vmatpush3.bf16.msra.mxu1 %v409_v2  ;;  %v275_v54 = vmul.f32 %v338_v36, %v269_v19  ;;  %p494_p4 = por %p493_p3, %p492_p2 }
  0x37   :  { %364 = vmatprep.subr.bf16.mxu0 %v410_v3  ;;  %385 = vmatprep.subr.bf16.mxu1 %v410_v3 }
  0x38   :  { %p495_p5 = pnand %p494_p4, %p488_p1 }
  0x3a   :  { %365 = vmatpush3.bf16.msra.mxu0 %v410_v3  ;;  %393 = vmatpush3.bf16.msra.mxu1 %v410_v3 }
  0x3b   :  { %366 = vmatprep.subr.bf16.mxu0 %v411_v6  ;;  %386 = vmatprep.subr.bf16.mxu1 %v411_v6 }
  0x3e   :  { %367 = vmatpush3.bf16.msra.mxu0 %v411_v6  ;;  %394 = vmatpush3.bf16.msra.mxu1 %v411_v6 }
  0x3f   :  { %368 = vmatprep.subr.bf16.mxu0 %v412_v7  ;;  %387 = vmatprep.subr.bf16.mxu1 %v412_v7 }
  0x42   :  { %369 = vmatpush3.bf16.msra.mxu0 %v412_v7  ;;  %395 = vmatpush3.bf16.msra.mxu1 %v412_v7 }
  0x43   :  { %370 = vmatprep.subr.bf16.mxu0 %v413_v8  ;;  %388 = vmatprep.subr.bf16.mxu1 %v413_v8 }
  0x46   :  { %371 = vmatpush3.bf16.msra.mxu0 %v413_v8  ;;  %396 = vmatpush3.bf16.msra.mxu1 %v413_v8 }
  0x47   :  { %372 = vmatprep.subr.bf16.mxu0 %v414_v9  ;;  %389 = vmatprep.subr.bf16.mxu1 %v414_v9 }
  0x4a   :  { %373 = vmatpush3.bf16.msra.mxu0 %v414_v9  ;;  %397 = vmatpush3.bf16.msra.mxu1 %v414_v9 }
  0x4d   :  { %375 = vmatmul.mubr.bf16.vlgmr.msra.gmra.mxu0 %v417_v10  ;;  %379 = vmatmul.mubr.bf16.vlgmr.msra.gmra.mxu1 %v418_v11 }
 0x10d   :  { %v376_v22 = vpop.f32.mrf.mxu0  ;;  %v380_v24 = vpop.f32.mrf.mxu1 }
 0x10e   :  { %v220_v27 = vadd.f32 %v376_v22, %v313_v18  ;;  %v236_v29 = vadd.f32 %v380_v24, %v313_v18 }
 0x10f   :  { %v211_v31 = vpop.f32.mrf.mxu0  ;;  %v227_v33 = vpop.f32.mrf.mxu1 }
 0x110   :  { %v247_v37 = vmul.f32 %v244_v23, %v220_v27  ;;  %v251_v38 = vmul.f32 %v244_v23, %v236_v29  ;;  %v212_v39 = vadd.f32 %v313_v18, %v211_v31  ;;  %v228_v40 = vadd.f32 %v313_v18, %v227_v33 }
 0x111   :  { %v377_v41 = vpop.f32.mrf.mxu0  ;;  %v381_v43 = vpop.f32.mrf.mxu1 }
 0x112   :  { %v280_v45 = vadd.f32 %v272_v28, %v247_v37  ;;  %v284_v46 = vadd.f32 %v276_v30, %v251_v38  ;;  %v245_v47 = vmul.f32 %v244_v23, %v212_v39  ;;  %v249_v48 = vmul.f32 %v244_v23, %v228_v40 }
 0x113   :  { %v223_v49 = vadd.f32 %v377_v41, %v313_v18  ;;  %v239_v50 = vadd.f32 %v381_v43, %v313_v18  ;;  %v214_v51 = vpop.f32.mrf.mxu0  ;;  %v230_v53 = vpop.f32.mrf.mxu1 }
 0x114   :  { %288 = vst [vmem:[#allocation10 + $0x10] sm:$0xff] %v280_v45  ;;  %292 = vst [vmem:[#allocation10 + $0x30] sm:$0xff] %v284_v46  ;;  %v278_v55 = vadd.f32 %v270_v32, %v245_v47  ;;  %v282_v56 = vadd.f32 %v274_v34, %v249_v48  ;;  %v215_v57 = vadd.f32 %v313_v18, %v214_v51 }
 0x115   :  { %v231_v58 = vadd.f32 %v313_v18, %v230_v53  ;;  %v248_v59 = vmul.f32 %v244_v23, %v223_v49  ;;  %v252_v60 = vmul.f32 %v244_v23, %v239_v50 }
 0x116   :  { %286 = vst [vmem:[#allocation10] sm:$0xff] %v278_v55  ;;  %290 = vst [vmem:[#allocation10 + $0x20] sm:$0xff] %v282_v56  ;;  %v246_v61 = vmul.f32 %v244_v23, %v215_v57 }
 0x117   :  { %v250_v62 = vmul.f32 %v244_v23, %v231_v58  ;;  %v281_v63 = vadd.f32 %v273_v42, %v248_v59  ;;  %v285_v0 = vadd.f32 %v277_v44, %v252_v60 }
 0x118   :  { %v279_v1 = vadd.f32 %v271_v52, %v246_v61 }
 0x119   :  { %v283_v2 = vadd.f32 %v275_v54, %v250_v62  ;;  %289 = vst [vmem:[#allocation10 + $0x18] sm:$0xff] %v281_v63  ;;  %293 = vst [vmem:[#allocation10 + $0x38] sm:$0xff] %v285_v0 }
 0x11a   :  { %287 = vst [vmem:[#allocation10 + $0x8] sm:$0xff] %v279_v1 }
 0x11b   :  { %291 = vst [vmem:[#allocation10 + $0x28] sm:$0xff] %v283_v2 }
 0x11c   :  { %498 = shalt.err (!%p495_p5)
}
 0x11d   :  { %s522_s15 = smov 128   ;;  %s523_s16 = smov 8  }
 0x11e   :  { %305 = dma.vmem_to_hbm [thread:$0]  %s300_s13, 1024, %s577_s5, [#allocation4], %s522_s15, %s522_s15, %s523_s16  }
 0x11f   :  { %513 = dma.done.wait [#allocation4], 1024  }
 0x120   :  { %514 = vsyncadd [#allocation4], 4294966272 }
 0x121   :  { %309 = vsyncpa [#allocation3], 1 }
 0x122   :  { %310 = vsyncpa [#allocation8], 1 }
 0x123   :  { %311 = vsyncpa [#allocation4], 1 }
 0x124   :  { %312 = vsyncpa [#allocation5], 1 }

</bundles_post_ra>
